<compile_context>
chip_gen: v7x
topology: tpu7x:2x2x1
jax: 0.10.0
libtpu: 0.0.40
codegen_flags: <defaults>
</compile_context>

<pallas_src>
import jax
import jax.numpy as jnp
from jax import lax
from jax.experimental import pallas as pl
from jax.experimental.pallas import tpu as pltpu


def _round_up(x, m):
    return ((x + m - 1) // m) * m


def _vmem_capacity_bytes():
    """Physical per-core VMEM; used to size tiles and vmem_limit_bytes."""
    try:
        info = pltpu.get_tpu_info()
        cap = int(getattr(info, "vmem_capacity_bytes", 0) or 0)
        if cap > 0:
            return cap
    except Exception:
        pass
    return 64 << 20  # conservative fallback (v7x per-TensorCore VMEM)


def _make_gp_kernel(use_lo_kstar_copy):
    """Builds the per-(M tile, K^{-1} column block) kernel.

    use_lo_kstar_copy: if True, a low-precision (stream-dtype) copy of k_star is
    written once per M tile and used as the MXU LHS (halves LHS VMEM reads, removes
    nj redundant full-tile casts).  f32 k_star is always kept for the quad slice.
    """

    def kernel(x_ref, zt_ref, zrow_ref, kinv_ref, yct_ref, scale_ref, params_ref,
               out_ref, *scratch):
        # x_ref     : (tm, D_pad)    raw test inputs (state dims rescaled in-kernel)
        # zt_ref    : (D_pad, N_pad) scaled training inputs, transposed (resident)
        # zrow_ref  : (1, N_pad)     log(outputscale) - 0.5*|z|^2/ls^2  (-1e30 on pads)
        # kinv_ref  : (N_pad, tn)    column block of (K + noise I)^{-1} (f32 or bf16)
        # yct_ref   : (1, tn)        column block of (y - mean_const)
        # scale_ref : (1, D_pad)     per-dim rescale (state dims) / ones elsewhere
        # params_ref: SMEM f32[6]  = [outputscale, log_outputscale, 1/ls^2, 0.5/ls^2,
        #                             mean_const, noise]
        # out_ref   : (2, tm)        row 0 = posterior mean, row 1 = posterior variance
        if use_lo_kstar_copy:
            kstar_sc, kstar_lo_sc, ones_sc, mean_sc, quad_sc = scratch
        else:
            kstar_sc, ones_sc, mean_sc, quad_sc = scratch
            kstar_lo_sc = None

        j = pl.program_id(1)
        nj = pl.num_programs(1)
        tn = kinv_ref.shape[-1]

        outputscale = params_ref[0]
        log_os = params_ref[1]
        inv_lsq = params_ref[2]        # 1 / lengthscale^2
        half_inv_lsq = params_ref[3]   # 0.5 / lengthscale^2
        mean_const = params_ref[4]
        noise = params_ref[5]

        @pl.when(j == 0)
        def _():
            # k_star for this M tile, computed once and reused for every column block.
            x = x_ref[...] * scale_ref[...]                       # (tm, D_pad) VPU
            cross = jnp.dot(x, zt_ref[...],
                            preferred_element_type=jnp.float32)   # (tm, N_pad) MXU
            sq_x = jnp.sum(x * x, axis=-1, keepdims=True)         # (tm, 1)
            # k = outputscale * exp(-0.5 d2 / ls^2) = exp(log_os - 0.5 d2 / ls^2)
            expo = inv_lsq * cross + zrow_ref[...] - half_inv_lsq * sq_x
            expo = jnp.minimum(expo, log_os)                      # clamp d2 >= 0
            k = jnp.exp(expo)                                     # EUP
            kstar_sc[...] = k
            if kstar_lo_sc is not None:
                kstar_lo_sc[...] = k.astype(kstar_lo_sc.dtype)    # cast ONCE per tile
            ones_sc[...] = jnp.ones_like(ones_sc)
            mean_sc[...] = jnp.zeros_like(mean_sc)
            quad_sc[...] = jnp.zeros_like(quad_sc)

        # tmp = k_star @ Kinv[:, block]   (MXU; f32 accumulate)
        lhs = kstar_lo_sc[...] if kstar_lo_sc is not None else kstar_sc[...]
        tmp = jnp.dot(lhs, kinv_ref[...],
                      preferred_element_type=jnp.float32)         # (tm, tn)

        col0 = pl.multiple_of(j * tn, tn)
        kstar_blk = kstar_sc[:, pl.ds(col0, tn)]                  # (tm, tn) f32 (quad)

        # Lane-dense accumulation: (1, tn) x (tm, tn) contracted on last dim -> (1, tm).
        dnums = (((1,), (1,)), ((), ()))
        mean_sc[...] += lax.dot_general(yct_ref[...], tmp, dnums,
                                        preferred_element_type=jnp.float32)
        quad_sc[...] += lax.dot_general(ones_sc[...], tmp * kstar_blk, dnums,
                                        preferred_element_type=jnp.float32)

        @pl.when(j == nj - 1)
        def _():
            out_ref[0:1, :] = mean_const + mean_sc[...]
            # NOTE: the clamp hides (does not fix) conditioning problems in K^{-1}.
            out_ref[1:2, :] = jnp.maximum(outputscale - quad_sc[...], 0.0) + noise

    return kernel


def _rbf_kernel_matrix(a, b, outputscale, lengthscale):
    d2 = jnp.sum((a[:, None, :] - b[None, :, :]) ** 2, axis=-1)
    return outputscale * jnp.exp(-0.5 * d2 / (lengthscale ** 2))


def reward_gp_set_data(train_states, train_actions, train_rewards, *,
                       state_scale, lengthscale, outputscale, noise,
                       tn=None, kinv_dtype=jnp.bfloat16):
    """RewardGP.set_data glue (plain JAX): scale states, Cholesky-solve for K^{-1},
    pad/transposes everything to TPU-friendly tiles.  Call ONCE per training set and
    reuse across forward calls (amortizes the O(N^3) factorization).

    kinv_dtype: bf16 by default (halves K^{-1} HBM traffic + VMEM; accumulation is
    still f32).  Pass jnp.float32 when high-accuracy posterior variance is required —
    with bf16 the variance is a difference of nearly-equal quantities.
    """
    train_states = jnp.asarray(train_states, jnp.float32)
    train_actions = jnp.asarray(train_actions, jnp.float32)
    train_rewards = jnp.asarray(train_rewards, jnp.float32)
    state_scale = jnp.asarray(state_scale, jnp.float32)

    N = train_states.shape[0]
    S = train_states.shape[1]
    A = train_actions.shape[1]
    D = S + A
    D_pad = _round_up(D, 8)           # align X / Z^T with native (8,128) sublane tiling

    Z = jnp.concatenate([train_states * state_scale[None, :], train_actions], -1)
    mean_const = jnp.mean(train_rewards)                        # TrainDatasetMean
    K = _rbf_kernel_matrix(Z, Z, outputscale, lengthscale)
    K = K + jnp.asarray(noise, jnp.float32) * jnp.eye(N, dtype=jnp.float32)
    cf = jax.scipy.linalg.cho_factor(K)                         # stabler than inv()
    kinv = jax.scipy.linalg.cho_solve(cf, jnp.eye(N, dtype=jnp.float32))
    yc = train_rewards - mean_const                             # alpha fused in-kernel

    # --- column-tile selection --------------------------------------------------
    vmem_cap = _vmem_capacity_bytes()
    itemsize = jnp.dtype(kinv_dtype).itemsize
    N_pad = _round_up(N, 128)
    divisors = [c for c in range(128, N_pad + 1, 128) if N_pad % c == 0]
    if tn is None:
        if 2 * N_pad * N_pad * itemsize <= int(0.45 * vmem_cap):
            tn_eff = N_pad           # K^{-1} fully resident; j axis collapses to 1
        else:
            tn_eff = max([c for c in divisors if c <= 512] or [128])
    else:
        tn_eff = max([c for c in divisors if c <= int(tn)] or [128])

    # --- padded, lane-dense buffers ----------------------------------------------
    # INVARIANT: padded rows/columns of kinv_pad and padded entries of yct_pad must
    # stay exactly zero; padded k_star columns are additionally forced to 0 via the
    # -1e30 entries of `zrow`, so results stay exact even if the padding here changes.
    Zt_pad = jnp.zeros((D_pad, N_pad), jnp.float32).at[:D, :N].set(Z.T)
    kinv_pad = jnp.zeros((N_pad, N_pad), jnp.float32).at[:N, :N].set(kinv)
    yct_pad = jnp.zeros((1, N_pad), jnp.float32).at[0, :N].set(yc)
    scale_vec = jnp.ones((1, D_pad), jnp.float32).at[0, :S].set(state_scale)

    os_ = jnp.asarray(outputscale, jnp.float32)
    ls_ = jnp.asarray(lengthscale, jnp.float32)
    log_os = jnp.log(os_)
    half_inv_lsq = 0.5 / (ls_ * ls_)
    sq_z = jnp.sum(Z * Z, axis=-1)
    zrow = jnp.full((1, N_pad), -1e30, jnp.float32).at[0, :N].set(
        log_os - half_inv_lsq * sq_z)

    params = jnp.stack([os_, log_os, 1.0 / (ls_ * ls_), half_inv_lsq,
                        mean_const, jnp.asarray(noise, jnp.float32)]).astype(jnp.float32)

    return {"Zt": Zt_pad, "zrow": zrow, "kinv": kinv_pad.astype(kinv_dtype),
            "ycT": yct_pad, "scale": scale_vec, "params": params,
            "N_pad": N_pad, "tn": tn_eff, "D": D, "D_pad": D_pad}


def reward_gp_forward(gp_data, states, actions, *, with_variance=False, tm=None):
    """RewardGP.forward: posterior mean (and variance incl. likelihood noise).

    tm=None auto-sizes the M tile toward the roofline crossover (target 512, capped by
    the per-generation VMEM budget; split in two for megacore when K^{-1} is resident)."""
    states = jnp.asarray(states, jnp.float32)
    actions = jnp.asarray(actions, jnp.float32)
    M = states.shape[0]
    D, D_pad = gp_data["D"], gp_data["D_pad"]
    N_pad, tn = gp_data["N_pad"], gp_data["tn"]
    kinv = gp_data["kinv"]
    kinv_item = jnp.dtype(kinv.dtype).itemsize
    stream_lo = kinv_item < 4          # bf16-streamed K^{-1} -> keep a bf16 k_star copy
    n_j = N_pad // tn

    # --- VMEM cost model (bytes) ---------------------------------------------------
    vmem_cap = _vmem_capacity_bytes()
    fixed = (2 * N_pad * tn * kinv_item        # Kinv column blocks (double-buffered)
             + 2 * D_pad * N_pad * 4           # Z^T (resident, budgeted x2)
             + 2 * N_pad * 4                   # zrow
             + 4 * tn * 4                      # (y - mean) column blocks
             + (2 << 20))                      # Mosaic internal scratch headroom
    per_tm = (N_pad * 4                                      # k_star f32 scratch
              + (N_pad * kinv_item if stream_lo else 0)      # low-precision k_star copy
              + 2 * D_pad * 4 + 32)                          # X tiles + acc/out rows

    if tm is None:
        budget = int(0.85 * vmem_cap)
        tm_cap = max(128, (budget - fixed) // per_tm)
        tm_eff = max(128, min(512, (tm_cap // 128) * 128))   # roofline target, VMEM-capped
        if M <= tm_eff:
            m_one = _round_up(M, 8)
            if n_j == 1 and m_one > 256:
                # K^{-1} resident: splitting the single tile is free HBM-wise and keeps
                # the second TensorCore (megacore / v7x) busy.
                tm_eff = min(tm_eff, _round_up((m_one + 1) // 2, 128))
            else:
                tm_eff = m_one
    else:
        tm_eff = _round_up(min(int(tm), _round_up(M, 8)), 8)

    M_pad = _round_up(M, tm_eff)
    grid = (M_pad // tm_eff, n_j)

    X = jnp.concatenate([states, actions], axis=-1)          # raw; rescaled in-kernel
    X_pad = jnp.zeros((M_pad, D_pad), jnp.float32).at[:M, :D].set(X)

    est = fixed + tm_eff * per_tm
    vmem_limit = int(min(max(est + (2 << 20), 32 << 20), int(0.92 * vmem_cap)))

    kernel = _make_gp_kernel(stream_lo)
    scratch_shapes = [pltpu.VMEM((tm_eff, N_pad), jnp.float32)]   # k_star (f32, quad path)
    if stream_lo:
        scratch_shapes.append(pltpu.VMEM((tm_eff, N_pad), kinv.dtype))  # bf16 k_star copy
    scratch_shapes += [pltpu.VMEM((1, tn), jnp.float32),          # ones row (hoisted)
                       pltpu.VMEM((1, tm_eff), jnp.float32),      # mean accumulator
                       pltpu.VMEM((1, tm_eff), jnp.float32)]      # quad accumulator

    out = pl.pallas_call(
        kernel,
        out_shape=jax.ShapeDtypeStruct((2, M_pad), jnp.float32),
        grid=grid,
        in_specs=[
            pl.BlockSpec((tm_eff, D_pad), lambda i, j: (i, 0)),    # X tile
            pl.BlockSpec((D_pad, N_pad), lambda i, j: (0, 0)),     # Z^T (resident, lane-dense)
            pl.BlockSpec((1, N_pad), lambda i, j: (0, 0)),         # log_os - 0.5|z|^2/ls^2
            pl.BlockSpec((N_pad, tn), lambda i, j: (0, j)),        # Kinv column block (streamed)
            pl.BlockSpec((1, tn), lambda i, j: (0, j)),            # (y - mean) column block
            pl.BlockSpec((1, D_pad), lambda i, j: (0, 0)),         # rescale vector
            pl.BlockSpec(memory_space=pltpu.SMEM),                 # scalar hyper-params
        ],
        out_specs=pl.BlockSpec((2, tm_eff), lambda i, j: (0, i)),  # lane-dense packed out
        scratch_shapes=scratch_shapes,
        compiler_params=pltpu.CompilerParams(
            dimension_semantics=("parallel", "arbitrary"),
            vmem_limit_bytes=vmem_limit),
    )(X_pad, gp_data["Zt"], gp_data["zrow"], kinv, gp_data["ycT"],
      gp_data["scale"], gp_data["params"])

    mean = out[0, :M]
    var = out[1, :M]
    if with_variance:
        return mean, var
    return mean


def _reference_forward(states, actions, train_states, train_actions, train_rewards,
                       *, state_scale, lengthscale, outputscale, noise):
    """Pure-JAX reference of the same GP posterior, for a correctness check."""
    Z = jnp.concatenate([train_states * state_scale[None, :], train_actions], -1)
    X = jnp.concatenate([states * state_scale[None, :], actions], -1)
    mean_const = jnp.mean(train_rewards)
    K = _rbf_kernel_matrix(Z, Z, outputscale, lengthscale) + noise * jnp.eye(Z.shape[0])
    kinv = jnp.linalg.inv(K)
    k_star = _rbf_kernel_matrix(X, Z, outputscale, lengthscale)
    mean = mean_const + k_star @ (kinv @ (train_rewards - mean_const))
    var = outputscale - jnp.sum((k_star @ kinv) * k_star, -1) + noise
    return mean, var


if __name__ == "__main__":
    latent_size, action_size = 4, 2
    N_train, M = 32, 16

    key = jax.random.PRNGKey(0)
    k1, k2, k3, k4, k5 = jax.random.split(key, 5)
    train_states = jax.random.normal(k1, (N_train, latent_size), jnp.float32)
    train_actions = jax.random.normal(k2, (N_train, action_size), jnp.float32)
    train_rewards = jax.random.normal(k3, (N_train,), jnp.float32)
    states = jax.random.normal(k4, (M, latent_size), jnp.float32)
    actions = jax.random.normal(k5, (M, action_size), jnp.float32)

    # deterministic GP hyper-parameters (synthetic init; no checkpoint load)
    state_scale = jnp.full((latent_size,), 0.5, jnp.float32)   # ScaleHandler rescale
    lengthscale = 1.3
    outputscale = 0.8
    noise = 0.1 * jnp.var(train_rewards)                       # init_noise_factor * var(y)

    ref_mean, ref_var = _reference_forward(
        states, actions, train_states, train_actions, train_rewards,
        state_scale=state_scale, lengthscale=lengthscale,
        outputscale=outputscale, noise=noise)

    # f32 K^{-1} path: accuracy-critical variance mode -> tight tolerance.
    gp_f32 = reward_gp_set_data(
        train_states, train_actions, train_rewards,
        state_scale=state_scale, lengthscale=lengthscale,
        outputscale=outputscale, noise=noise, kinv_dtype=jnp.float32)
    mean, var = reward_gp_forward(gp_f32, states, actions, with_variance=True)
    jax.block_until_ready((mean, var))
    assert mean.shape == (M,) and var.shape == (M,)
    assert jnp.allclose(mean, ref_mean, rtol=1e-3, atol=1e-3)
    assert jnp.allclose(var, ref_var, rtol=1e-3, atol=1e-3)

    # Default path: bf16-streamed K^{-1} (half the HBM traffic / VMEM on all gens).
    # Mean loses ~bf16 relative precision (documented trade-off); variance is
    # precision-sensitive, so only a loose/finite check here.
    gp_bf16 = reward_gp_set_data(
        train_states, train_actions, train_rewards,
        state_scale=state_scale, lengthscale=lengthscale,
        outputscale=outputscale, noise=noise)                  # kinv_dtype=bf16 default
    mean16, var16 = reward_gp_forward(gp_bf16, states, actions, with_variance=True)
    jax.block_until_ready((mean16, var16))
    assert bool(jnp.all(jnp.isfinite(mean16))) and bool(jnp.all(jnp.isfinite(var16)))
    assert jnp.allclose(mean16, ref_mean, rtol=0.1, atol=0.1)

    # Exercise the mean-only branch of forward().
    mean_only = reward_gp_forward(gp_bf16, states, actions)
    jax.block_until_ready(mean_only)
    assert mean_only.shape == (M,)

    print("KERNEL_OK")
</pallas_src>

<mosaic_0001>
module attributes {stable_mosaic.version = 11 : i64} {
  func.func @kernel(%arg0: i32, %arg1: i32, %arg2: memref<16x8xf32, #tpu.memory_space<vmem>>, %arg3: memref<8x128xf32, #tpu.memory_space<vmem>>, %arg4: memref<1x128xf32, #tpu.memory_space<vmem>>, %arg5: memref<128x128xf32, #tpu.memory_space<vmem>>, %arg6: memref<1x128xf32, #tpu.memory_space<vmem>>, %arg7: memref<1x8xf32, #tpu.memory_space<vmem>>, %arg8: memref<6xf32, #tpu.memory_space<smem>>, %arg9: memref<2x16xf32, #tpu.memory_space<vmem>>, %arg10: memref<16x128xf32, #tpu.memory_space<vmem>>, %arg11: memref<1x128xf32, #tpu.memory_space<vmem>>, %arg12: memref<1x16xf32, #tpu.memory_space<vmem>>, %arg13: memref<1x16xf32, #tpu.memory_space<vmem>>) attributes {dimension_semantics = [#tpu.dimension_semantics<parallel>, #tpu.dimension_semantics<arbitrary>], iteration_bounds = array<i64: 1, 1>, scalar_prefetch = 0 : i64, scratch_operands = 4 : i64, tpu.core_type = #tpu.core_type<tc>, window_params = [{transform_indices = @transform_0, window_bounds = array<i64: 16, 8>}, {pipeline_mode = #tpu.pipeline_mode<synchronous>, transform_indices = @transform_1, window_bounds = array<i64: 8, 128>}, {pipeline_mode = #tpu.pipeline_mode<synchronous>, transform_indices = @transform_2, window_bounds = array<i64: 1, 128>}, {transform_indices = @transform_3, window_bounds = array<i64: 128, 128>}, {transform_indices = @transform_4, window_bounds = array<i64: 1, 128>}, {pipeline_mode = #tpu.pipeline_mode<synchronous>, transform_indices = @transform_5, window_bounds = array<i64: 1, 8>}, {transform_indices = @transform_6, window_bounds = array<i64: 6>}, {transform_indices = @transform_7, window_bounds = array<i64: 2, 16>}]} {
    %c0 = arith.constant 0 : index
    %0 = memref.load %arg8[%c0] : memref<6xf32, #tpu.memory_space<smem>>
    %c1 = arith.constant 1 : index
    %1 = memref.load %arg8[%c1] : memref<6xf32, #tpu.memory_space<smem>>
    %c2 = arith.constant 2 : index
    %2 = memref.load %arg8[%c2] : memref<6xf32, #tpu.memory_space<smem>>
    %c3 = arith.constant 3 : index
    %3 = memref.load %arg8[%c3] : memref<6xf32, #tpu.memory_space<smem>>
    %c4 = arith.constant 4 : index
    %4 = memref.load %arg8[%c4] : memref<6xf32, #tpu.memory_space<smem>>
    %c5 = arith.constant 5 : index
    %5 = memref.load %arg8[%c5] : memref<6xf32, #tpu.memory_space<smem>>
    %c0_i32 = arith.constant 0 : i32
    %6 = arith.cmpi eq, %arg1, %c0_i32 : i32
    %7 = arith.extui %6 : i1 to i32
    %c0_i32_0 = arith.constant 0 : i32
    %8 = arith.cmpi ne, %7, %c0_i32_0 : i32
    scf.if %8 {
      %c0_22 = arith.constant 0 : index
      %c0_23 = arith.constant 0 : index
      %30 = vector.load %arg2[%c0_22, %c0_23] : memref<16x8xf32, #tpu.memory_space<vmem>>, vector<16x8xf32>
      %c0_24 = arith.constant 0 : index
      %c0_25 = arith.constant 0 : index
      %31 = vector.load %arg7[%c0_24, %c0_25] : memref<1x8xf32, #tpu.memory_space<vmem>>, vector<1x8xf32>
      %32 = vector.broadcast %31 : vector<1x8xf32> to vector<16x8xf32>
      %33 = arith.mulf %30, %32 : vector<16x8xf32>
      %c0_26 = arith.constant 0 : index
      %c0_27 = arith.constant 0 : index
      %34 = vector.load %arg3[%c0_26, %c0_27] : memref<8x128xf32, #tpu.memory_space<vmem>>, vector<8x128xf32>
      %cst_28 = arith.constant dense<0.000000e+00> : vector<16x128xf32>
      %35 = tpu.matmul %33, %34, %cst_28 {dimension_numbers = #tpu.dot_dimension_numbers<[1], [0], [0], [1], [0, 0, 1, 1], [], []>} : vector<16x8xf32>, vector<8x128xf32>, vector<16x128xf32> -> vector<16x128xf32>
      %36 = arith.mulf %33, %33 : vector<16x8xf32>
      %cst_29 = arith.constant dense<0.000000e+00> : vector<16xf32>
      %37 = vector.multi_reduction <add>, %36, %cst_29 [1] : vector<16x8xf32> to vector<16xf32>
      %38 = vector.shape_cast %37 : vector<16xf32> to vector<16x1xf32>
      %39 = vector.broadcast %2 : f32 to vector<16x128xf32>
      %40 = arith.mulf %39, %35 : vector<16x128xf32>
      %c0_30 = arith.constant 0 : index
      %c0_31 = arith.constant 0 : index
      %41 = vector.load %arg4[%c0_30, %c0_31] : memref<1x128xf32, #tpu.memory_space<vmem>>, vector<1x128xf32>
      %42 = vector.broadcast %41 : vector<1x128xf32> to vector<16x128xf32>
      %43 = arith.addf %40, %42 : vector<16x128xf32>
      %44 = vector.broadcast %3 : f32 to vector<16x1xf32>
      %45 = arith.mulf %44, %38 : vector<16x1xf32>
      %46 = vector.broadcast %45 : vector<16x1xf32> to vector<16x128xf32>
      %47 = arith.subf %43, %46 : vector<16x128xf32>
      %48 = vector.broadcast %1 : f32 to vector<16x128xf32>
      %49 = arith.minimumf %47, %48 : vector<16x128xf32>
      %50 = math.exp %49 : vector<16x128xf32>
      %c0_32 = arith.constant 0 : index
      %c0_33 = arith.constant 0 : index
      %51 = vector.load %arg10[%c0_32, %c0_33] : memref<16x128xf32, #tpu.memory_space<vmem>>, vector<16x128xf32>
      tpu.vector_store %arg10[%c0_32, %c0_33], %50 {strides = array<i32>} : memref<16x128xf32, #tpu.memory_space<vmem>>, vector<16x128xf32>,
      %cst_34 = arith.constant 1.000000e+00 : f32
      %52 = vector.broadcast %cst_34 : f32 to vector<1x128xf32>
      %c0_35 = arith.constant 0 : index
      %c0_36 = arith.constant 0 : index
      %53 = vector.load %arg11[%c0_35, %c0_36] : memref<1x128xf32, #tpu.memory_space<vmem>>, vector<1x128xf32>
      tpu.vector_store %arg11[%c0_35, %c0_36], %52 {strides = array<i32>} : memref<1x128xf32, #tpu.memory_space<vmem>>, vector<1x128xf32>,
      %cst_37 = arith.constant 0.000000e+00 : f32
      %54 = vector.broadcast %cst_37 : f32 to vector<1x16xf32>
      %c0_38 = arith.constant 0 : index
      %c0_39 = arith.constant 0 : index
      %55 = vector.load %arg12[%c0_38, %c0_39] : memref<1x16xf32, #tpu.memory_space<vmem>>, vector<1x16xf32>
      tpu.vector_store %arg12[%c0_38, %c0_39], %54 {strides = array<i32>} : memref<1x16xf32, #tpu.memory_space<vmem>>, vector<1x16xf32>,
      %cst_40 = arith.constant 0.000000e+00 : f32
      %56 = vector.broadcast %cst_40 : f32 to vector<1x16xf32>
      %c0_41 = arith.constant 0 : index
      %c0_42 = arith.constant 0 : index
      %57 = vector.load %arg13[%c0_41, %c0_42] : memref<1x16xf32, #tpu.memory_space<vmem>>, vector<1x16xf32>
      tpu.vector_store %arg13[%c0_41, %c0_42], %56 {strides = array<i32>} : memref<1x16xf32, #tpu.memory_space<vmem>>, vector<1x16xf32>,
    } else {
    }
    %c0_1 = arith.constant 0 : index
    %c0_2 = arith.constant 0 : index
    %9 = vector.load %arg10[%c0_1, %c0_2] : memref<16x128xf32, #tpu.memory_space<vmem>>, vector<16x128xf32>
    %c0_3 = arith.constant 0 : index
    %c0_4 = arith.constant 0 : index
    %10 = vector.load %arg5[%c0_3, %c0_4] : memref<128x128xf32, #tpu.memory_space<vmem>>, vector<128x128xf32>
    %cst = arith.constant dense<0.000000e+00> : vector<16x128xf32>
    %11 = tpu.matmul %9, %10, %cst {dimension_numbers = #tpu.dot_dimension_numbers<[1], [0], [0], [1], [0, 0, 1, 1], [], []>} : vector<16x128xf32>, vector<128x128xf32>, vector<16x128xf32> -> vector<16x128xf32>
    %c128_i32 = arith.constant 128 : i32
    %12 = arith.muli %arg1, %c128_i32 : i32
    %13 = tpu.assume_multiple %12, 128 : i32
    %c0_5 = arith.constant 0 : index
    %14 = arith.index_cast %13 : i32 to index
    %15 = vector.load %arg10[%c0_5, %14] : memref<16x128xf32, #tpu.memory_space<vmem>>, vector<16x128xf32>
    %c0_6 = arith.constant 0 : index
    %c0_7 = arith.constant 0 : index
    %16 = vector.load %arg12[%c0_6, %c0_7] : memref<1x16xf32, #tpu.memory_space<vmem>>, vector<1x16xf32>
    %c0_8 = arith.constant 0 : index
    %c0_9 = arith.constant 0 : index
    %17 = vector.load %arg6[%c0_8, %c0_9] : memref<1x128xf32, #tpu.memory_space<vmem>>, vector<1x128xf32>
    %cst_10 = arith.constant dense<0.000000e+00> : vector<1x16xf32>
    %18 = tpu.matmul %17, %11, %cst_10 {dimension_numbers = #tpu.dot_dimension_numbers<[1], [1], [0], [0], [0, 0, 1, 0], [], []>} : vector<1x128xf32>, vector<16x128xf32>, vector<1x16xf32> -> vector<1x16xf32>
    %19 = arith.addf %16, %18 : vector<1x16xf32>
    %c0_11 = arith.constant 0 : index
    %c0_12 = arith.constant 0 : index
    %20 = vector.load %arg12[%c0_11, %c0_12] : memref<1x16xf32, #tpu.memory_space<vmem>>, vector<1x16xf32>
    tpu.vector_store %arg12[%c0_11, %c0_12], %19 {strides = array<i32>} : memref<1x16xf32, #tpu.memory_space<vmem>>, vector<1x16xf32>,
    %c0_13 = arith.constant 0 : index
    %c0_14 = arith.constant 0 : index
    %21 = vector.load %arg13[%c0_13, %c0_14] : memref<1x16xf32, #tpu.memory_space<vmem>>, vector<1x16xf32>
    %c0_15 = arith.constant 0 : index
    %c0_16 = arith.constant 0 : index
    %22 = vector.load %arg11[%c0_15, %c0_16] : memref<1x128xf32, #tpu.memory_space<vmem>>, vector<1x128xf32>
    %23 = arith.mulf %11, %15 : vector<16x128xf32>
    %cst_17 = arith.constant dense<0.000000e+00> : vector<1x16xf32>
    %24 = tpu.matmul %22, %23, %cst_17 {dimension_numbers = #tpu.dot_dimension_numbers<[1], [1], [0], [0], [0, 0, 1, 0], [], []>} : vector<1x128xf32>, vector<16x128xf32>, vector<1x16xf32> -> vector<1x16xf32>
    %25 = arith.addf %21, %24 : vector<1x16xf32>
    %c0_18 = arith.constant 0 : index
    %c0_19 = arith.constant 0 : index
    %26 = vector.load %arg13[%c0_18, %c0_19] : memref<1x16xf32, #tpu.memory_space<vmem>>, vector<1x16xf32>
    tpu.vector_store %arg13[%c0_18, %c0_19], %25 {strides = array<i32>} : memref<1x16xf32, #tpu.memory_space<vmem>>, vector<1x16xf32>,
    %c0_i32_20 = arith.constant 0 : i32
    %27 = arith.cmpi eq, %arg1, %c0_i32_20 : i32
    %28 = arith.extui %27 : i1 to i32
    %c0_i32_21 = arith.constant 0 : i32
    %29 = arith.cmpi ne, %28, %c0_i32_21 : i32
    scf.if %29 {
      %c0_22 = arith.constant 0 : index
      %c0_23 = arith.constant 0 : index
      %30 = vector.load %arg12[%c0_22, %c0_23] : memref<1x16xf32, #tpu.memory_space<vmem>>, vector<1x16xf32>
      %31 = vector.broadcast %4 : f32 to vector<1x16xf32>
      %32 = arith.addf %31, %30 : vector<1x16xf32>
      %c0_24 = arith.constant 0 : index
      %c0_25 = arith.constant 0 : index
      %33 = vector.load %arg9[%c0_24, %c0_25] : memref<2x16xf32, #tpu.memory_space<vmem>>, vector<1x16xf32>
      tpu.vector_store %arg9[%c0_24, %c0_25], %32 {strides = array<i32>} : memref<2x16xf32, #tpu.memory_space<vmem>>, vector<1x16xf32>,
      %c0_26 = arith.constant 0 : index
      %c0_27 = arith.constant 0 : index
      %34 = vector.load %arg13[%c0_26, %c0_27] : memref<1x16xf32, #tpu.memory_space<vmem>>, vector<1x16xf32>
      %35 = vector.broadcast %0 : f32 to vector<1x16xf32>
      %36 = arith.subf %35, %34 : vector<1x16xf32>
      %cst_28 = arith.constant 0.000000e+00 : f32
      %37 = vector.broadcast %cst_28 : f32 to vector<1x16xf32>
      %38 = arith.maximumf %36, %37 : vector<1x16xf32>
      %39 = vector.broadcast %5 : f32 to vector<1x16xf32>
      %40 = arith.addf %38, %39 : vector<1x16xf32>
      %c1_29 = arith.constant 1 : index
      %c0_30 = arith.constant 0 : index
      %41 = vector.load %arg9[%c1_29, %c0_30] : memref<2x16xf32, #tpu.memory_space<vmem>>, vector<1x16xf32>
      tpu.vector_store %arg9[%c1_29, %c0_30], %40 {strides = array<i32>} : memref<2x16xf32, #tpu.memory_space<vmem>>, vector<1x16xf32>,
    } else {
    }
    return
  }
  func.func @transform_0(%arg0: i32, %arg1: i32) -> (i32, i32) {
    %c0_i32 = arith.constant 0 : i32
    %c0_i32_0 = arith.constant 0 : i32
    return %arg0, %c0_i32 : i32, i32
  }
  func.func @transform_1(%arg0: i32, %arg1: i32) -> (i32, i32) {
    %c0_i32 = arith.constant 0 : i32
    %c0_i32_0 = arith.constant 0 : i32
    %c0_i32_1 = arith.constant 0 : i32
    return %c0_i32, %c0_i32_0 : i32, i32
  }
  func.func @transform_2(%arg0: i32, %arg1: i32) -> (i32, i32) {
    %c0_i32 = arith.constant 0 : i32
    %c0_i32_0 = arith.constant 0 : i32
    %c0_i32_1 = arith.constant 0 : i32
    return %c0_i32, %c0_i32_0 : i32, i32
  }
  func.func @transform_3(%arg0: i32, %arg1: i32) -> (i32, i32) {
    %c0_i32 = arith.constant 0 : i32
    %c0_i32_0 = arith.constant 0 : i32
    return %c0_i32, %arg1 : i32, i32
  }
  func.func @transform_4(%arg0: i32, %arg1: i32) -> (i32, i32) {
    %c0_i32 = arith.constant 0 : i32
    %c0_i32_0 = arith.constant 0 : i32
    return %c0_i32, %arg1 : i32, i32
  }
  func.func @transform_5(%arg0: i32, %arg1: i32) -> (i32, i32) {
    %c0_i32 = arith.constant 0 : i32
    %c0_i32_0 = arith.constant 0 : i32
    %c0_i32_1 = arith.constant 0 : i32
    return %c0_i32, %c0_i32_0 : i32, i32
  }
  func.func @transform_6(%arg0: i32, %arg1: i32) -> i32 {
    %c0_i32 = arith.constant 0 : i32
    %c0_i32_0 = arith.constant 0 : i32
    return %c0_i32 : i32
  }
  func.func @transform_7(%arg0: i32, %arg1: i32) -> (i32, i32) {
    %c0_i32 = arith.constant 0 : i32
    %c0_i32_0 = arith.constant 0 : i32
    return %c0_i32, %arg0 : i32, i32
  }
}

</mosaic_0001>

<bundles_post_ra>
// kernel: tpu_custom_call.1
= control target key start
LH: loop header
LB: loop body
LE: loop exit
PB: predicated region body
PF: predicated region fallthrough
CT: control target
= control target key end

     0   :  { %12 = vsyncpa [#allocation7], 0  ;;  %s784_s0 = inlined_call_operand.vmem [shape: f32[16,8], index: 0, kind: input, shape index: {}]   ;;  %s785_s1 = inlined_call_operand.vmem [shape: f32[8,128], index: 1, kind: input, shape index: {}]   ;;  %s786_s2 = inlined_call_operand.vmem [shape: f32[1,128], index: 2, kind: input, shape index: {}]   ;;  %s787_s3 = inlined_call_operand.hbm [shape: f32[128,128], index: 3, kind: input, shape index: {}]   ;;  %s788_s4 = inlined_call_operand.vmem [shape: f32[1,128], index: 4, kind: input, shape index: {}]   ;;  %s789_s5 = inlined_call_operand.vmem [shape: f32[1,8], index: 5, kind: input, shape index: {}]   ;;  %s790_s6 = inlined_call_operand.vmem [shape: f32[6], index: 6, kind: input, shape index: {}]   ;;  %s791_s7 = inlined_call_operand.hbm [shape: f32[2,16], index: 7, kind: output, shape index: {}]  }
   0x1   :  { %13 = vsyncpa [#allocation9], 0 }
   0x2   :  { %14 = vsyncpa [#allocation8], 0  ;;  %s680_s24 = smov [#allocation6]   ;;  %s43_s28 = sshll.u32 %s790_s6, 4  ;;  %s44_s28 = int_to_ptr.vmem [resolvable:$true] %s43_s28 }
   0x3   :  { %s26_s25 = sshll.u32 %s680_s24, 4  ;;  %s618_s8 = scalar_lea.hbm %s787_s3, 2048  ;;  %s27_s25 = int_to_ptr.vmem [resolvable:$true] %s26_s25 }
   0x4   :  { %p619_p0 = scmp.ne.s32.totalorder %s787_s3, %s618_s8  ;;  %p622_p1 = scmp.lt.u32.totalorder %s618_s8, %s787_s3 }
   0x6   :  { %p624_p2 = pnand %p622_p1, %p619_p0 }
   0x8   :  { %627 = shalt.err (!%p624_p2)
}
   0x9   :  { %s628_s13 = scalar_lea.vmem %s27_s25, 2048  ;;  %p633_p4 = scmp.lt.s32.totalorder %s27_s25, %s27_s25 }
   0xa   :  { %p629_p3 = scmp.ne.s32.totalorder %s27_s25, %s628_s13  ;;  %p634_p5 = scmp.lt.s32.totalorder %s628_s13, %s628_s13 }
   0xc   :  { %p635_p6 = por %p634_p5, %p633_p4 }
   0xe   :  { %p636_p7 = pnand %p635_p6, %p629_p3 }
  0x10   :  { %639 = shalt.err (!%p636_p7)
}
  0x11   :  { %s681_s6 = smov 128   ;;  %s682_s14 = smov 8  }
  0x12   :  { %32 = dma.hbm_to_vmem [thread:$0]  %s787_s3, 2048, %s27_s25, [#allocation7], %s681_s6, %s681_s6, %s682_s14  }
  0x13   :  { %s640_s17 = scalar_lea.vmem %s44_s28, 16  ;;  %p645_p9 = scmp.lt.s32.totalorder %s44_s28, %s44_s28 }
  0x14   :  { %p641_p8 = scmp.ne.s32.totalorder %s44_s28, %s640_s17  ;;  %p646_p10 = scmp.lt.s32.totalorder %s640_s17, %s640_s17 }
  0x16   :  { %p647_p11 = por %p646_p10, %p645_p9 }
  0x18   :  { %p648_p12 = pnand %p647_p11, %p641_p8 }
  0x1a   :  { %651 = shalt.err (!%p648_p12)
}
  0x1b   :  { %s683_s18 = smov [#allocation10]  }
  0x1c   :  { %46 = dma.vmem_to_smem %s44_s28, 16, %s683_s18, [#allocation9]  }
  0x1d   :  { %674 = dma.done.wait [#allocation7], 2048  }
  0x1e   :  { %675 = vsyncadd [#allocation7], 4294965248 }
  0x1f   :  { %676 = dma.done.wait [#allocation9], 16  }
  0x20   :  { %677 = vsyncadd [#allocation9], 4294967280 }
  0x21   :  { %53 = sfence }
  0x22   :  { %v75_v0 = vld [vmem:[%s785_s1] sm:$0xff]  ;;  %v65_v2 = vld [vmem:[%s784_s0 + $0x8] sm:$0xff]  ;;  %vm76_vm0 = vcmask 64512   ;;  %v200_v9 = vld [vmem:[#allocation6 + $0x10] sm:$0xff]  ;;  %s479_s1 = sld [smem:[#allocation10 + $0x3]]  ;;  %v684_v56 = vmov 0.0|0.0  }
  0x23   :  { %v64_v1 = vld [vmem:[%s784_s0] sm:$0xff]  ;;  %513 = vmatprep.subr.mxu0 %v75_v0  ;;  %v199_v5 = vld [vmem:[#allocation6 + $0x8] sm:$0xff]  ;;  %v204_v19 = vld [vmem:[#allocation6 + $0x30] sm:$0xff]  ;;  %s478_s0 = sld [smem:[#allocation10 + $0x2]]  ;;  %vm193_vm1 = vcmask 122880   ;;  %v685_v57 = vmov 0.0  }
  0x24   :  { %v482_v3 = vld [vmem:[%s789_s5] ss:$0 sm:$0xff]  ;;  %v198_v4 = vld [vmem:[#allocation6] sm:$0xff]  ;;  %514 = vmatpush3.msra.mxu0 %v75_v0  ;;  %v203_v17 = vld [vmem:[#allocation6 + $0x28] sm:$0xff]  ;;  %s477_s5 = sld [smem:[#allocation10 + $0x1]]  ;;  %vm686_vm2 = vmmov 0  }
  0x25   :  { %v73_v6 = vmul.f32 %v482_v3, %v64_v1  ;;  %v74_v7 = vmul.f32 %v482_v3, %v65_v2  ;;  %v567_v8 = vpack.c.bf16 %v199_v5, %v198_v4  ;;  %v201_v10 = vld [vmem:[#allocation6 + $0x18] sm:$0xff]  ;;  %v202_v16 = vld [vmem:[#allocation6 + $0x20] sm:$0xff]  ;;  %v207_v23 = vld [vmem:[#allocation6 + $0x48] sm:$0xff]  ;;  %599 = vmatprep.subr.bf16.mxu0 %v684_v56  ;;  %194 = vst.msk [vmem:[#allocation4] sm:$0x1] %vm193_vm1, %v685_v57  ;;  %v687_v58 = vmov 1.0  }
  0x26   :  { %v571_v11 = vpack.c.bf16 %v201_v10, %v200_v9  ;;  %v575_v18 = vpack.c.bf16 %v203_v17, %v202_v16  ;;  %v205_v20 = vld [vmem:[#allocation6 + $0x38] sm:$0xff]  ;;  %v206_v22 = vld [vmem:[#allocation6 + $0x40] sm:$0xff]  ;;  %v208_v25 = vld [vmem:[#allocation6 + $0x50] sm:$0xff]  ;;  %195 = vst.msk [vmem:[#allocation5] sm:$0x1] %vm193_vm1, %v685_v57  ;;  %s480_s29 = sld [smem:[#allocation10 + $0x4]] }
  0x27   :  { %515 = vmatprep.mubr.msk.f32.mxu0 %vm76_vm0, %v73_v6  ;;  %v158_v12 = vmul.f32 %v73_v6, %v73_v6  ;;  %v159_v13 = vmul.f32 %v74_v7, %v74_v7  ;;  %568 = vmatprep.subr.bf16.mxu1 %v567_v8  ;;  %v579_v21 = vpack.c.bf16 %v205_v20, %v204_v19  ;;  %v209_v26 = vld [vmem:[#allocation6 + $0x58] sm:$0xff]  ;;  %v210_v28 = vld [vmem:[#allocation6 + $0x60] sm:$0xff]  ;;  %v211_v29 = vld [vmem:[#allocation6 + $0x68] sm:$0xff]  ;;  %s54_s30 = sld [smem:[#allocation10]]  ;;  %s688_s8 = smov [#allocation11]  }
  0x28   :  { %516 = vmatmul.mubr.msk.f32.vlgmr.msra.gmra.mrb[0].mxu0 %vm76_vm0, %v74_v7  ;;  %570 = vmatpush3.bf16.msra.mxu1 %v567_v8  ;;  %v583_v24 = vpack.c.bf16 %v207_v23, %v206_v22  ;;  %v587_v27 = vpack.c.bf16 %v209_v26, %v208_v25  ;;  %v212_v30 = vld [vmem:[#allocation6 + $0x70] sm:$0xff]  ;;  %v591_v31 = vpack.c.bf16 %v211_v29, %v210_v28  ;;  %v213_v32 = vld [vmem:[#allocation6 + $0x78] sm:$0xff]  ;;  %v178_v37 = vstv %s479_s1  ;;  %s466_s9 = sshll.u32 %s688_s8, 4  ;;  %s467_s9 = int_to_ptr.vmem [resolvable:$true] %s466_s9 }
  0x29   :  { %v160_v14 = vsel %vm76_vm0, %v158_v12, 0.0  ;;  %572 = vmatprep.subr.bf16.mxu1 %v571_v11  ;;  %v163_v15 = vsel %vm76_vm0, %v159_v13, 0.0  ;;  %v595_v33 = vpack.c.bf16 %v213_v32, %v212_v30  ;;  %v166_v35 = vstv %s478_s0  ;;  %v485_v39 = vld [vmem:[%s786_s2] ss:$0 sm:$0xff]  ;;  %557 = vmatprep.mubr.msk.f32.mxu0 %vm686_vm2, %v685_v57  ;;  %192 = vst [vmem:[#allocation3] sm:$0x1] %v687_v58  ;;  %p657_p0 = scmp.lt.s32.totalorder %s467_s9, %s467_s9 }
  0x2a   :  { %161 = vadd.xlane.f32.xlu0 %v160_v14  ;;  %v183_v47 = vstv %s477_s5  ;;  %v296_v1 = vld [vmem:[%s788_s4] sm:$0x1]  ;;  %s481_s4 = sld [smem:[#allocation10 + $0x5]]  ;;  %s652_s10 = scalar_lea.vmem %s467_s9, 32 }
  0x2b   :  { %p653_p13 = scmp.ne.s32.totalorder %s467_s9, %s652_s10  ;;  %p658_p1 = scmp.lt.s32.totalorder %s652_s10, %s652_s10 }
  0x2c   :  { %574 = vmatpush3.bf16.msra.mxu1 %v571_v11  ;;  %v295_v3 = vld [vmem:[#allocation4] sm:$0x1]  ;;  %v450_v9 = vstv %s480_s29 }
  0x2d   :  { %576 = vmatprep.subr.bf16.mxu1 %v575_v18  ;;  %v370_v7 = vld [vmem:[#allocation5] sm:$0x1]  ;;  %v454_v14 = vstv %s54_s30  ;;  %p659_p2 = por %p658_p1, %p657_p0 }
  0x2e   :  { %164 = vadd.xlane.f32.xlu0 %v163_v15 }
  0x2f   :  { %p660_p3 = pnand %p659_p2, %p653_p13 }
  0x30   :  { %578 = vmatpush3.bf16.msra.mxu1 %v575_v18  ;;  %v371_v2 = vld [vmem:[#allocation3] sm:$0x1]  ;;  %v457_v17 = vstv %s481_s4 }
  0x31   :  { %580 = vmatprep.subr.bf16.mxu1 %v579_v21 }
  0x34   :  { %582 = vmatpush3.bf16.msra.mxu1 %v579_v21 }
  0x35   :  { %584 = vmatprep.subr.bf16.mxu1 %v583_v24 }
  0x38   :  { %586 = vmatpush3.bf16.msra.mxu1 %v583_v24 }
  0x39   :  { %588 = vmatprep.subr.bf16.mxu1 %v587_v27 }
  0x3c   :  { %590 = vmatpush3.bf16.msra.mxu1 %v587_v27 }
  0x3d   :  { %592 = vmatprep.subr.bf16.mxu1 %v591_v31 }
  0x40   :  { %594 = vmatpush3.bf16.msra.mxu1 %v591_v31 }
  0x41   :  { %596 = vmatprep.subr.bf16.mxu1 %v595_v33 }
  0x44   :  { %598 = vmatpush3.bf16.msra.mxu1 %v595_v33 }
  0xb7   :  { %v162_v34 = vpop.xlane.xlu0 %161 }
  0xb8   :  { %v179_v45 = vmul.f32 %v178_v37, %v162_v34 }
  0xbb   :  { %v165_v36 = vpop.xlane.xlu0 %164 }
  0xbc   :  { %v180_v42 = vmul.f32 %v178_v37, %v165_v36 }
  0xfb   :  { %v517_v38 = vpop.f32.mrb[0].mxu0 }
  0xfc   :  { %v168_v40 = vmul.f32 %v517_v38, %v166_v35  ;;  %v149_v41 = vpop.f32.mrb[1].mxu0 }
  0xfd   :  { %v167_v43 = vmul.f32 %v166_v35, %v149_v41 }
  0xfe   :  { %v177_v44 = vadd.f32 %v485_v39, %v168_v40 }
  0xff   :  { %v176_v46 = vadd.f32 %v485_v39, %v167_v43 }
 0x100   :  { %v182_v48 = vsub.f32 %v177_v44, %v180_v42 }
 0x101   :  { %v181_v49 = vsub.f32 %v176_v46, %v179_v45 }
 0x102   :  { %v185_v50 = vmin.f32 %v182_v48, %v183_v47 }
 0x103   :  { %v184_v51 = vmin.f32 %v181_v49, %v183_v47 }
 0x104   :  { %v188_v52 = vmul.f32 1.442695, %v185_v50 }
 0x105   :  { %v186_v53 = vmul.f32 1.442695, %v184_v51 }
 0x107   :  { %614 = vpow2.f32 %v186_v53 }
 0x108   :  { %616 = vpow2.f32 %v188_v52 }
 0x111   :  { %v615_v54 = vpop.eup %614 }
 0x112   :  { %v617_v55 = vpop.eup %616  ;;  %550 = vmatprep.mubr.f32.mxu1 %v615_v54 }
 0x113   :  { %551 = vmatmul.mubr.f32.vlgmr.msra.gmra.mrb[0].mxu1 %v617_v55 }
 0x1e6   :  { %v552_v59 = vpop.f32.mrb[0].mxu1 }
 0x1e7   :  { %v373_v60 = vmul.f32 %v617_v55, %v552_v59  ;;  %v280_v61 = vpop.f32.mrb[1].mxu1 }
 0x1e8   :  { %v600_v62 = vpack.c.bf16 %v552_v59, %v280_v61  ;;  %v372_v63 = vmul.f32 %v615_v54, %v280_v61 }
 0x1ea   :  { %v603_v0 = vpack.c.bf16 %v373_v60, %v372_v63  ;;  %601 = vmatpush3.bf16.xpose.msra.mxu0 %v600_v62 }
 0x1eb   :  { %602 = vmatprep.subr.bf16.mxu0 %v684_v56 }
 0x1f1   :  { %558 = vmatmul.mubr.f32.vlgmr.msra.gmra.mrb[2].mxu0 %v296_v1 }
 0x1f2   :  { %604 = vmatpush3.bf16.xpose.msra.mxu0 %v603_v0  ;;  %564 = vmatprep.mubr.msk.f32.mxu0 %vm686_vm2, %v685_v57 }
 0x1f9   :  { %565 = vmatmul.mubr.f32.vlgmr.msra.gmra.mrb[4].mxu0 %v371_v2 }
 0x2c4   :  { %v363_v4 = vpop.f32.mrb[2].mxu0 }
 0x2c5   :  { %v367_v5 = vadd.f32 %v363_v4, %v295_v3  ;;  %v559_v6 = vpop.f32.mrb[3].mxu0 }
 0x2c7   :  { %369 = vst.msk [vmem:[#allocation4] sm:$0x1] %vm193_vm1, %v367_v5 }
 0x2cc   :  { %v440_v8 = vpop.f32.mrb[4].mxu0 }
 0x2cd   :  { %v444_v10 = vadd.f32 %v440_v8, %v370_v7  ;;  %v566_v11 = vpop.f32.mrb[5].mxu0 }
 0x2ce   :  { %v449_v12 = vld [vmem:[#allocation4] sm:$0x1] }
 0x2cf   :  { %445 = vst.msk [vmem:[#allocation5] sm:$0x1] %vm193_vm1, %v444_v10  ;;  %v451_v13 = vadd.f32 %v450_v9, %v449_v12 }
 0x2d1   :  { %452 = vst.msk [vmem:[#allocation11] sm:$0x1] %vm193_vm1, %v451_v13 }
 0x2d6   :  { %v453_v15 = vld [vmem:[#allocation5] sm:$0x1] }
 0x2d7   :  { %v455_v16 = vsub.f32 %v454_v14, %v453_v15 }
 0x2d9   :  { %v456_v18 = vmax.f32 %v455_v16, 0.0 }
 0x2db   :  { %v458_v19 = vadd.f32 %v457_v17, %v456_v18 }
 0x2dd   :  { %459 = vst.msk [vmem:[#allocation11 + $0x1] sm:$0x1] %vm193_vm1, %v458_v19 }
 0x2de   :  { %663 = shalt.err (!%p660_p3)
}
 0x2df   :  { %s664_s13 = scalar_lea.hbm %s791_s7, 32 }
 0x2e0   :  { %p665_p4 = scmp.ne.s32.totalorder %s791_s7, %s664_s13  ;;  %p668_p5 = scmp.lt.u32.totalorder %s664_s13, %s791_s7 }
 0x2e2   :  { %p670_p6 = pnand %p668_p5, %p665_p4 }
 0x2e4   :  { %673 = shalt.err (!%p670_p6)
}
 0x2e5   :  { %469 = dma.vmem_to_hbm [thread:$0]  %s467_s9, 32, %s791_s7, [#allocation8]  }
 0x2e6   :  { %678 = dma.done.wait [#allocation8], 32  }
 0x2e7   :  { %679 = vsyncadd [#allocation8], 4294967264 }
 0x2e8   :  { %473 = vsyncpa [#allocation7], 1 }
 0x2e9   :  { %474 = vsyncpa [#allocation8], 1 }
 0x2ea   :  { %475 = vsyncpa [#allocation9], 1 }

</bundles_post_ra>
